<compile_context>
chip_gen: v5e
topology: v5e:2x2
jax: 0.10.0
libtpu: 0.0.40
codegen_flags: <defaults>
</compile_context>

<pallas_src>
import functools

import jax
import jax.numpy as jnp
from jax.experimental import pallas as pl
from jax.experimental.pallas import tpu as pltpu

_LANES = 128


def _round_up(a, b):
    return ((a + b - 1) // b) * b


def _sc_loss_kernel(x_ref, y_ref, num_ref, den_ref, *,
                    total_rows, block_rows, steps):
    """Accumulate sum((y-x)^2) and sum(y^2) into resident (8, freq) f32 outputs."""
    p = pl.program_id(0)   # partition (megacore "parallel") axis
    j = pl.program_id(1)   # reduction ("arbitrary") axis, last in grid

    @pl.when(j == 0)
    def _init():
        num_ref[...] = jnp.zeros_like(num_ref)
        den_ref[...] = jnp.zeros_like(den_ref)

    # Logical row range this grid step is responsible for.  The input
    # index_map clamps the DMA'd block index, so steps that fall entirely past
    # the array simply re-see the last (already resident) block and are fully
    # masked here (rows_valid <= 0).
    row0 = (p * steps + j) * block_rows
    rows_valid = total_rows - row0          # may be <= 0 or >= block_rows

    x = x_ref[...]
    y = y_ref[...]

    def _accumulate(xv, yv):
        # Subtract in the input dtype (native bf16 VPU on v6e/v7x), square and
        # accumulate in f32.  Only the row axis is reduced per step (pure VPU
        # adds + a tiny sublane fold); the (1, freq) partial broadcasts into
        # all 8 rows of the resident accumulator as plain full-vreg adds.
        d = (yv - xv).astype(jnp.float32)
        yf = yv.astype(jnp.float32)
        num_ref[...] = num_ref[...] + jnp.sum(d * d, axis=0, keepdims=True)
        den_ref[...] = den_ref[...] + jnp.sum(yf * yf, axis=0, keepdims=True)

    @pl.when(rows_valid >= block_rows)      # fast path: interior block, no mask
    def _full():
        _accumulate(x, y)

    @pl.when(rows_valid < block_rows)       # ragged tail / fully-masked block
    def _tail():
        rid = jax.lax.broadcasted_iota(jnp.int32, x.shape, 0)
        keep = rid < rows_valid
        _accumulate(jnp.where(keep, x, 0), jnp.where(keep, y, 0))


def spectral_convergence_loss(x_mag, y_mag, *, target_block_bytes=2 * 1024 * 1024):
    """Pallas TPU implementation of SpectralConvergengeLoss.forward.

    Args:
        x_mag: (B, #frames, #freq_bins) predicted magnitude spectrogram.
        y_mag: (B, #frames, #freq_bins) ground-truth magnitude spectrogram.
        target_block_bytes: target VMEM footprint of one input buffer per grid
            step (~2-4 MiB keeps per-step overhead small on v5e/v6e/v7x while
            staying well inside the raised scoped-VMEM limit).
    Returns:
        float32 scalar loss  ==  ||y - x||_F / ||y||_F.
    """
    assert x_mag.shape == y_mag.shape, (x_mag.shape, y_mag.shape)
    dtype = jnp.promote_types(x_mag.dtype, y_mag.dtype)
    x_mag = x_mag.astype(dtype)
    y_mag = y_mag.astype(dtype)

    cols = x_mag.shape[-1]
    # Free view: collapsing leading dims of a contiguous array is a no-copy
    # reshape, and row blocks with full freq width are contiguous HBM chunks.
    x2d = x_mag.reshape(-1, cols)
    y2d = y_mag.reshape(-1, cols)
    rows = x2d.shape[0]
    n = rows * cols
    itemsize = jnp.dtype(dtype).itemsize

    # dtype-aware sublane packing: 8 (f32) / 16 (bf16) / 32 (int8/fp8).
    sub = max(8, 32 // itemsize)

    # Rows per block, sized to ~target_block_bytes of VMEM per input buffer
    # (rows are padded to a 128-lane multiple in VMEM).
    bytes_per_row = _round_up(cols, _LANES) * itemsize
    cap = max(sub, (target_block_bytes // bytes_per_row) // sub * sub)

    # Megacore split: shard rows across 2 TensorCores whenever each core gets
    # at least a handful of vreg row-groups; on 1-TC chips (v5e/v6e) the extra
    # "parallel" axis is a near-free serial loop.
    num_partitions = 2 if rows >= 16 * sub else 1
    rows_per_part = pl.cdiv(rows, num_partitions)
    block_rows = min(cap, _round_up(rows_per_part, sub))
    steps = pl.cdiv(rows_per_part, block_rows)
    last_block = (rows - 1) // block_rows   # clamp target: never DMA past the array

    def in_index_map(pi, ji):
        return (jnp.minimum(pi * steps + ji, last_block), 0)

    in_spec = pl.BlockSpec((block_rows, cols), in_index_map)
    # Constant across the reduction axis -> resident per-partition accumulator.
    out_spec = pl.BlockSpec((8, cols), lambda pi, ji: (pi, 0))

    out_rows = num_partitions * 8
    cost = pl.CostEstimate(
        flops=5 * n,
        transcendentals=0,
        bytes_accessed=2 * n * itemsize + 2 * out_rows * cols * 4,
    )

    kernel = functools.partial(
        _sc_loss_kernel, total_rows=rows, block_rows=block_rows, steps=steps)

    num_out, den_out = pl.pallas_call(
        kernel,
        out_shape=(
            jax.ShapeDtypeStruct((out_rows, cols), jnp.float32),
            jax.ShapeDtypeStruct((out_rows, cols), jnp.float32),
        ),
        grid_spec=pltpu.PrefetchScalarGridSpec(
            num_scalar_prefetch=0,
            grid=(num_partitions, steps),
            in_specs=[in_spec, in_spec],
            out_specs=[out_spec, out_spec],
        ),
        compiler_params=pltpu.CompilerParams(
            dimension_semantics=("parallel", "arbitrary"),
            vmem_limit_bytes=48 * 1024 * 1024,
        ),
        cost_estimate=cost,
    )(x2d, y2d)

    # Each partition's accumulator holds identical per-column sums in all 8
    # sublane rows; take one row per partition, then do the single tiny
    # cross-lane reduce + sqrt/div in XLA.  NaN when ||y||_F == 0, matching
    # the PyTorch reference (no epsilon).
    num = jnp.sum(num_out[::8, :])
    den = jnp.sum(den_out[::8, :])
    return jnp.sqrt(num) / jnp.sqrt(den)


if __name__ == "__main__":
    key = jax.random.PRNGKey(0)
    kx, ky = jax.random.split(key)

    def ref_loss(x, y):
        x = x.astype(jnp.float32)
        y = y.astype(jnp.float32)
        return jnp.linalg.norm((y - x).ravel()) / jnp.linalg.norm(y.ravel())

    # 1) Small shape consistent with the module: (batch, #frames, #freq_bins).
    B, T, F = 2, 16, 32
    x1 = jnp.abs(jax.random.normal(kx, (B, T, F), dtype=jnp.float32))
    y1 = jnp.abs(jax.random.normal(ky, (B, T, F), dtype=jnp.float32))
    out1 = jax.block_until_ready(spectral_convergence_loss(x1, y1))
    r1 = ref_loss(x1, y1)
    assert jnp.allclose(out1, r1, rtol=1e-4, atol=1e-6), (out1, r1)

    # 2) STFT-like ragged shape (257 bins): exercises the 2-partition split
    #    and the in-kernel ragged-tail masking (no wrapper pad copy).
    B2, T2, F2 = 3, 171, 257
    x2 = jnp.abs(jax.random.normal(kx, (B2, T2, F2), dtype=jnp.float32))
    y2 = jnp.abs(jax.random.normal(ky, (B2, T2, F2), dtype=jnp.float32))
    out2 = jax.block_until_ready(spectral_convergence_loss(x2, y2))
    r2 = ref_loss(x2, y2)
    assert jnp.allclose(out2, r2, rtol=1e-4, atol=1e-6), (out2, r2)

    # 3) Tiny block budget: exercises multi-step reduction, the partial tail
    #    block and the clamped (fully masked) trailing grid step.
    B3, T3, F3 = 1, 130, 257
    x3 = jnp.abs(jax.random.normal(kx, (B3, T3, F3), dtype=jnp.float32))
    y3 = jnp.abs(jax.random.normal(ky, (B3, T3, F3), dtype=jnp.float32))
    out3 = jax.block_until_ready(
        spectral_convergence_loss(x3, y3, target_block_bytes=96 * 1024))
    r3 = ref_loss(x3, y3)
    assert jnp.allclose(out3, r3, rtol=1e-4, atol=1e-6), (out3, r3)

    # 4) bf16 inputs: native 16-sublane packing, bf16 subtract, f32 accumulate.
    x4 = x2.astype(jnp.bfloat16)
    y4 = y2.astype(jnp.bfloat16)
    out4 = jax.block_until_ready(spectral_convergence_loss(x4, y4))
    r4 = ref_loss(x4, y4)
    assert jnp.allclose(out4, r4, rtol=1e-2, atol=1e-4), (out4, r4)

    print("KERNEL_OK")
</pallas_src>

<mosaic_0001>
module attributes {stable_mosaic.version = 11 : i64} {
  func.func @_sc_loss_kernel(%arg0: i32, %arg1: i32, %arg2: memref<32x32xf32, #tpu.memory_space<vmem>>, %arg3: memref<32x32xf32, #tpu.memory_space<vmem>>, %arg4: memref<8x32xf32, #tpu.memory_space<vmem>>, %arg5: memref<8x32xf32, #tpu.memory_space<vmem>>) attributes {dimension_semantics = [#tpu.dimension_semantics<parallel>, #tpu.dimension_semantics<arbitrary>], iteration_bounds = array<i64: 1, 1>, scalar_prefetch = 0 : i64, scratch_operands = 0 : i64, tpu.core_type = #tpu.core_type<tc>, window_params = [{transform_indices = @transform_0, window_bounds = array<i64: 32, 32>}, {transform_indices = @transform_1, window_bounds = array<i64: 32, 32>}, {transform_indices = @transform_2, window_bounds = array<i64: 8, 32>}, {transform_indices = @transform_3, window_bounds = array<i64: 8, 32>}]} {
    %c0_i32 = arith.constant 0 : i32
    %0 = arith.cmpi eq, %arg1, %c0_i32 : i32
    %1 = arith.extui %0 : i1 to i32
    %c0_i32_0 = arith.constant 0 : i32
    %2 = arith.cmpi ne, %1, %c0_i32_0 : i32
    scf.if %2 {
      %cst = arith.constant 0.000000e+00 : f32
      %15 = vector.broadcast %cst : f32 to vector<8x32xf32>
      %c0_9 = arith.constant 0 : index
      %c0_10 = arith.constant 0 : index
      %16 = vector.load %arg4[%c0_9, %c0_10] : memref<8x32xf32, #tpu.memory_space<vmem>>, vector<8x32xf32>
      tpu.vector_store %arg4[%c0_9, %c0_10], %15 {strides = array<i32>} : memref<8x32xf32, #tpu.memory_space<vmem>>, vector<8x32xf32>,
      %cst_11 = arith.constant 0.000000e+00 : f32
      %17 = vector.broadcast %cst_11 : f32 to vector<8x32xf32>
      %c0_12 = arith.constant 0 : index
      %c0_13 = arith.constant 0 : index
      %18 = vector.load %arg5[%c0_12, %c0_13] : memref<8x32xf32, #tpu.memory_space<vmem>>, vector<8x32xf32>
      tpu.vector_store %arg5[%c0_12, %c0_13], %17 {strides = array<i32>} : memref<8x32xf32, #tpu.memory_space<vmem>>, vector<8x32xf32>,
    } else {
    }
    %c1_i32 = arith.constant 1 : i32
    %3 = arith.muli %arg0, %c1_i32 : i32
    %4 = arith.addi %3, %arg1 : i32
    %c32_i32 = arith.constant 32 : i32
    %5 = arith.muli %4, %c32_i32 : i32
    %c32_i32_1 = arith.constant 32 : i32
    %6 = arith.subi %c32_i32_1, %5 : i32
    %c0 = arith.constant 0 : index
    %c0_2 = arith.constant 0 : index
    %7 = vector.load %arg2[%c0, %c0_2] : memref<32x32xf32, #tpu.memory_space<vmem>>, vector<32x32xf32>
    %c0_3 = arith.constant 0 : index
    %c0_4 = arith.constant 0 : index
    %8 = vector.load %arg3[%c0_3, %c0_4] : memref<32x32xf32, #tpu.memory_space<vmem>>, vector<32x32xf32>
    %c32_i32_5 = arith.constant 32 : i32
    %9 = arith.cmpi sge, %6, %c32_i32_5 : i32
    %10 = arith.extui %9 : i1 to i32
    %c0_i32_6 = arith.constant 0 : i32
    %11 = arith.cmpi ne, %10, %c0_i32_6 : i32
    scf.if %11 {
      %15 = arith.subf %8, %7 : vector<32x32xf32>
      %c0_9 = arith.constant 0 : index
      %c0_10 = arith.constant 0 : index
      %16 = vector.load %arg4[%c0_9, %c0_10] : memref<8x32xf32, #tpu.memory_space<vmem>>, vector<8x32xf32>
      %17 = arith.mulf %15, %15 : vector<32x32xf32>
      %cst = arith.constant dense<0.000000e+00> : vector<32xf32>
      %18 = vector.multi_reduction <add>, %17, %cst [0] : vector<32x32xf32> to vector<32xf32>
      %19 = vector.shape_cast %18 : vector<32xf32> to vector<1x32xf32>
      %20 = vector.broadcast %19 : vector<1x32xf32> to vector<8x32xf32>
      %21 = arith.addf %16, %20 : vector<8x32xf32>
      %c0_11 = arith.constant 0 : index
      %c0_12 = arith.constant 0 : index
      %22 = vector.load %arg4[%c0_11, %c0_12] : memref<8x32xf32, #tpu.memory_space<vmem>>, vector<8x32xf32>
      tpu.vector_store %arg4[%c0_11, %c0_12], %21 {strides = array<i32>} : memref<8x32xf32, #tpu.memory_space<vmem>>, vector<8x32xf32>,
      %c0_13 = arith.constant 0 : index
      %c0_14 = arith.constant 0 : index
      %23 = vector.load %arg5[%c0_13, %c0_14] : memref<8x32xf32, #tpu.memory_space<vmem>>, vector<8x32xf32>
      %24 = arith.mulf %8, %8 : vector<32x32xf32>
      %cst_15 = arith.constant dense<0.000000e+00> : vector<32xf32>
      %25 = vector.multi_reduction <add>, %24, %cst_15 [0] : vector<32x32xf32> to vector<32xf32>
      %26 = vector.shape_cast %25 : vector<32xf32> to vector<1x32xf32>
      %27 = vector.broadcast %26 : vector<1x32xf32> to vector<8x32xf32>
      %28 = arith.addf %23, %27 : vector<8x32xf32>
      %c0_16 = arith.constant 0 : index
      %c0_17 = arith.constant 0 : index
      %29 = vector.load %arg5[%c0_16, %c0_17] : memref<8x32xf32, #tpu.memory_space<vmem>>, vector<8x32xf32>
      tpu.vector_store %arg5[%c0_16, %c0_17], %28 {strides = array<i32>} : memref<8x32xf32, #tpu.memory_space<vmem>>, vector<8x32xf32>,
    } else {
    }
    %c32_i32_7 = arith.constant 32 : i32
    %12 = arith.cmpi slt, %6, %c32_i32_7 : i32
    %13 = arith.extui %12 : i1 to i32
    %c0_i32_8 = arith.constant 0 : i32
    %14 = arith.cmpi ne, %13, %c0_i32_8 : i32
    scf.if %14 {
      %15 = tpu.iota {dimensions = array<i32: 0>} : vector<32x32xi32>
      %16 = vector.broadcast %6 : i32 to vector<32x32xi32>
      %17 = arith.cmpi slt, %15, %16 : vector<32x32xi32>
      %c0_i32_9 = arith.constant 0 : i32
      %18 = arith.sitofp %c0_i32_9 : i32 to f32
      %19 = vector.broadcast %18 : f32 to vector<32x32xf32>
      %20 = arith.select %17, %7, %19 : vector<32x32xi1>, vector<32x32xf32>
      %c0_i32_10 = arith.constant 0 : i32
      %21 = arith.sitofp %c0_i32_10 : i32 to f32
      %22 = vector.broadcast %21 : f32 to vector<32x32xf32>
      %23 = arith.select %17, %8, %22 : vector<32x32xi1>, vector<32x32xf32>
      %24 = arith.subf %23, %20 : vector<32x32xf32>
      %c0_11 = arith.constant 0 : index
      %c0_12 = arith.constant 0 : index
      %25 = vector.load %arg4[%c0_11, %c0_12] : memref<8x32xf32, #tpu.memory_space<vmem>>, vector<8x32xf32>
      %26 = arith.mulf %24, %24 : vector<32x32xf32>
      %cst = arith.constant dense<0.000000e+00> : vector<32xf32>
      %27 = vector.multi_reduction <add>, %26, %cst [0] : vector<32x32xf32> to vector<32xf32>
      %28 = vector.shape_cast %27 : vector<32xf32> to vector<1x32xf32>
      %29 = vector.broadcast %28 : vector<1x32xf32> to vector<8x32xf32>
      %30 = arith.addf %25, %29 : vector<8x32xf32>
      %c0_13 = arith.constant 0 : index
      %c0_14 = arith.constant 0 : index
      %31 = vector.load %arg4[%c0_13, %c0_14] : memref<8x32xf32, #tpu.memory_space<vmem>>, vector<8x32xf32>
      tpu.vector_store %arg4[%c0_13, %c0_14], %30 {strides = array<i32>} : memref<8x32xf32, #tpu.memory_space<vmem>>, vector<8x32xf32>,
      %c0_15 = arith.constant 0 : index
      %c0_16 = arith.constant 0 : index
      %32 = vector.load %arg5[%c0_15, %c0_16] : memref<8x32xf32, #tpu.memory_space<vmem>>, vector<8x32xf32>
      %33 = arith.mulf %23, %23 : vector<32x32xf32>
      %cst_17 = arith.constant dense<0.000000e+00> : vector<32xf32>
      %34 = vector.multi_reduction <add>, %33, %cst_17 [0] : vector<32x32xf32> to vector<32xf32>
      %35 = vector.shape_cast %34 : vector<32xf32> to vector<1x32xf32>
      %36 = vector.broadcast %35 : vector<1x32xf32> to vector<8x32xf32>
      %37 = arith.addf %32, %36 : vector<8x32xf32>
      %c0_18 = arith.constant 0 : index
      %c0_19 = arith.constant 0 : index
      %38 = vector.load %arg5[%c0_18, %c0_19] : memref<8x32xf32, #tpu.memory_space<vmem>>, vector<8x32xf32>
      tpu.vector_store %arg5[%c0_18, %c0_19], %37 {strides = array<i32>} : memref<8x32xf32, #tpu.memory_space<vmem>>, vector<8x32xf32>,
    } else {
    }
    return
  }
  func.func @transform_0(%arg0: i32, %arg1: i32) -> (i32, i32) {
    %c1_i32 = arith.constant 1 : i32
    %0 = arith.muli %arg0, %c1_i32 : i32
    %1 = arith.addi %0, %arg1 : i32
    %c0_i32 = arith.constant 0 : i32
    %2 = arith.minsi %1, %c0_i32 : i32
    %c0_i32_0 = arith.constant 0 : i32
    %c0_i32_1 = arith.constant 0 : i32
    return %2, %c0_i32_0 : i32, i32
  }
  func.func @transform_1(%arg0: i32, %arg1: i32) -> (i32, i32) {
    %c1_i32 = arith.constant 1 : i32
    %0 = arith.muli %arg0, %c1_i32 : i32
    %1 = arith.addi %0, %arg1 : i32
    %c0_i32 = arith.constant 0 : i32
    %2 = arith.minsi %1, %c0_i32 : i32
    %c0_i32_0 = arith.constant 0 : i32
    %c0_i32_1 = arith.constant 0 : i32
    return %2, %c0_i32_0 : i32, i32
  }
  func.func @transform_2(%arg0: i32, %arg1: i32) -> (i32, i32) {
    %c0_i32 = arith.constant 0 : i32
    %c0_i32_0 = arith.constant 0 : i32
    return %arg0, %c0_i32 : i32, i32
  }
  func.func @transform_3(%arg0: i32, %arg1: i32) -> (i32, i32) {
    %c0_i32 = arith.constant 0 : i32
    %c0_i32_0 = arith.constant 0 : i32
    return %arg0, %c0_i32 : i32, i32
  }
}

</mosaic_0001>

<bundles_post_ra>
// kernel: tpu_custom_call.1
= control target key start
LH: loop header
LB: loop body
LE: loop exit
PB: predicated region body
PF: predicated region fallthrough
CT: control target
= control target key end

     0   :  { %9 = vsyncpa [#allocation3], 0  ;;  %s401_s0 = inlined_call_operand.hbm [shape: f32[32,32], index: 0, kind: input, shape index: {}]   ;;  %s402_s1 = inlined_call_operand.hbm [shape: f32[32,32], index: 1, kind: input, shape index: {}]   ;;  %s403_s2 = inlined_call_operand.hbm [shape: f32[8,32], index: 2, kind: output, shape index: {0}]   ;;  %s404_s3 = inlined_call_operand.hbm [shape: f32[8,32], index: 3, kind: output, shape index: {1}]  }
   0x1   :  { %10 = vsyncpa [#allocation6], 0 }
   0x2   :  { %11 = vsyncpa [#allocation4], 0 }
   0x3   :  { %12 = vsyncpa [#allocation9], 0  ;;  %s23_s14 = sshll.u32 %s401_s0, 4  ;;  %s350_s15 = smov [#allocation2]   ;;  %s24_s14 = int_to_ptr.hbm [resolvable:$true] %s23_s14 }
   0x4   :  { %s25_s16 = sshll.u32 %s350_s15, 4  ;;  %s42_s19 = sshll.u32 %s402_s1, 4  ;;  %s26_s16 = int_to_ptr.vmem [resolvable:$true] %s25_s16  ;;  %s43_s19 = int_to_ptr.hbm [resolvable:$true] %s42_s19 }
   0x5   :  { %s351_s20 = smov 128   ;;  %s352_s21 = smov 8  }
   0x6   :  { %31 = dma.hbm_to_vmem [thread:$0]  %s24_s14, 512, %s26_s16, [#allocation3], %s351_s20, %s351_s20, %s352_s21  }
   0x7   :  { %s353_s22 = smov [#allocation5]  }
   0x8   :  { %s44_s23 = sshll.u32 %s353_s22, 4  ;;  %s45_s23 = int_to_ptr.vmem [resolvable:$true] %s44_s23 }
   0x9   :  { %50 = dma.hbm_to_vmem [thread:$0]  %s43_s19, 512, %s45_s23, [#allocation6], %s351_s20, %s351_s20, %s352_s21  }
   0xa   :  { %342 = dma.done.wait [#allocation3], 512  }
   0xb   :  { %343 = vsyncadd [#allocation3], 4294966784 }
   0xc   :  { %344 = dma.done.wait [#allocation6], 512  }
   0xd   :  { %345 = vsyncadd [#allocation6], 4294966784  ;;  %vm71_vm0 = vcmask 261120   ;;  %v354_v0 = vmov 0.0   ;;  %v77_v1 = vld [vmem:[#allocation2] sm:$0xff]  ;;  %v78_v2 = vld [vmem:[#allocation2 + $0x8] sm:$0xff] }
   0xe   :  { %72 = vst.msk [vmem:[#allocation7] sm:$0xff] %vm71_vm0, %v354_v0  ;;  %v79_v3 = vld [vmem:[#allocation2 + $0x10] sm:$0xff]  ;;  %v80_v4 = vld [vmem:[#allocation2 + $0x18] sm:$0xff]  ;;  %v81_v5 = vld [vmem:[#allocation5] sm:$0xff]  ;;  %s355_s0 = smov [#allocation8]   ;;  %s219_s26 = sshll.u32 %s404_s3, 4  ;;  %s220_s26 = int_to_ptr.hbm [resolvable:$true] %s219_s26 }
   0xf   :  { %73 = vst.msk [vmem:[#allocation8] sm:$0xff] %vm71_vm0, %v354_v0  ;;  %v82_v6 = vld [vmem:[#allocation5 + $0x8] sm:$0xff]  ;;  %v83_v7 = vld [vmem:[#allocation5 + $0x10] sm:$0xff]  ;;  %v84_v8 = vld [vmem:[#allocation5 + $0x18] sm:$0xff]  ;;  %v89_v9 = vsub.f32 %v81_v5, %v77_v1  ;;  %v115_v11 = vmul.f32 %v81_v5, %v81_v5  ;;  %s217_s1 = sshll.u32 %s355_s0, 4  ;;  %s356_s27 = smov [#allocation7]   ;;  %s218_s1 = int_to_ptr.vmem [resolvable:$true] %s217_s1 }
  0x10   :  { %v90_v10 = vsub.f32 %v82_v6, %v78_v2  ;;  %v116_v12 = vmul.f32 %v82_v6, %v82_v6  ;;  %v91_v13 = vsub.f32 %v83_v7, %v79_v3  ;;  %v92_v14 = vsub.f32 %v84_v8, %v80_v4  ;;  %s206_s28 = sshll.u32 %s356_s27, 4  ;;  %s208_s4 = sshll.u32 %s403_s2, 4  ;;  %s207_s28 = int_to_ptr.vmem [resolvable:$true] %s206_s28  ;;  %s209_s4 = int_to_ptr.hbm [resolvable:$true] %s208_s4 }
  0x11   :  { %v117_v15 = vmul.f32 %v83_v7, %v83_v7  ;;  %v118_v16 = vmul.f32 %v84_v8, %v84_v8  ;;  %v94_v17 = vmul.f32 %v89_v9, %v89_v9  ;;  %v119_v19 = vsel %vm71_vm0, %v115_v11, 0.0 }
  0x12   :  { %v95_v18 = vmul.f32 %v90_v10, %v90_v10  ;;  %v120_v20 = vsel %vm71_vm0, %v116_v12, 0.0  ;;  %v96_v21 = vmul.f32 %v91_v13, %v91_v13  ;;  %v97_v22 = vmul.f32 %v92_v14, %v92_v14 }
  0x13   :  { %v121_v23 = vadd.f32 %v120_v20, %v119_v19  ;;  %v122_v24 = vsel %vm71_vm0, %v117_v15, 0.0  ;;  %v99_v25 = vsel %vm71_vm0, %v94_v17, 0.0  ;;  %v124_v27 = vsel %vm71_vm0, %v118_v16, 0.0 }
  0x14   :  { %v100_v26 = vsel %vm71_vm0, %v95_v18, 0.0  ;;  %v102_v29 = vsel %vm71_vm0, %v96_v21, 0.0  ;;  %v104_v31 = vsel %vm71_vm0, %v97_v22, 0.0 }
  0x15   :  { %v101_v28 = vadd.f32 %v100_v26, %v99_v25  ;;  %v123_v30 = vadd.f32 %v122_v24, %v121_v23  ;;  %v93_v47 = vld [vmem:[#allocation7] sm:$0xff] }
  0x16   :  { %v114_v44 = vld [vmem:[#allocation8] sm:$0xff] }
  0x17   :  { %v103_v32 = vadd.f32 %v102_v29, %v101_v28  ;;  %v125_v33 = vadd.f32 %v124_v27, %v123_v30 }
  0x19   :  { %v105_v34 = vadd.f32 %v104_v31, %v103_v32  ;;  %v126_v35 = vrot.slane %v125_v33, 4 }
  0x1b   :  { %v106_v36 = vrot.slane %v105_v34, 4  ;;  %v127_v37 = vadd.f32 %v126_v35, %v125_v33 }
  0x1d   :  { %v107_v38 = vadd.f32 %v106_v36, %v105_v34  ;;  %v128_v39 = vrot.slane %v127_v37, 2 }
  0x1f   :  { %v108_v40 = vrot.slane %v107_v38, 2  ;;  %v129_v41 = vadd.f32 %v128_v39, %v127_v37 }
  0x21   :  { %v109_v42 = vadd.f32 %v108_v40, %v107_v38  ;;  %v130_v43 = vrot.slane %v129_v41, 1 }
  0x23   :  { %v110_v45 = vrot.slane %v109_v42, 1  ;;  %v131_v46 = vadd.f32 %v130_v43, %v129_v41 }
  0x25   :  { %v111_v48 = vadd.f32 %v110_v45, %v109_v42  ;;  %v132_v49 = vadd.f32 %v131_v46, %v114_v44 }
  0x27   :  { %v112_v50 = vadd.f32 %v111_v48, %v93_v47  ;;  %133 = vst.msk [vmem:[#allocation8] sm:$0xff] %vm71_vm0, %v132_v49 }
  0x28   :  { %222 = dma.vmem_to_hbm [thread:$0]  %s218_s1, 128, %s220_s26, [#allocation9]  }
  0x29   :  { %113 = vst.msk [vmem:[#allocation7] sm:$0xff] %vm71_vm0, %v112_v50 }
  0x2a   :  { %211 = dma.vmem_to_hbm [thread:$0]  %s207_s28, 128, %s209_s4, [#allocation4]  }
  0x2b   :  { %346 = dma.done.wait [#allocation4], 128  }
  0x2c   :  { %347 = vsyncadd [#allocation4], 4294967168 }
  0x2d   :  { %348 = dma.done.wait [#allocation9], 128  }
  0x2e   :  { %349 = vsyncadd [#allocation9], 4294967168 }
  0x2f   :  { %231 = vsyncpa [#allocation3], 1 }
  0x30   :  { %232 = vsyncpa [#allocation6], 1 }
  0x31   :  { %233 = vsyncpa [#allocation4], 1 }
  0x32   :  { %234 = vsyncpa [#allocation9], 1 }

</bundles_post_ra>
